<compile_context>
chip_gen: v7x
topology: tpu7x:2x2x1
jax: 0.10.0
libtpu: 0.0.40
codegen_flags: <defaults>
</compile_context>

<pallas_src>
import functools

import jax
import jax.numpy as jnp
from jax.experimental import pallas as pl
from jax.experimental.pallas import tpu as pltpu

IN = 784
H1 = 128
H2 = 256
OUT = 10
OUT_PAD = 128   # 10 padded up to one full lane group (lane-dense stores)


def _round_up(x, m):
    return ((x + m - 1) // m) * m


def mlp_kernel(x_ref, w1_ref, b1_ref, w2_ref, b2_ref, w3_ref, b3_ref, o_ref):
    # bf16 cast in-kernel (VPU) so HBM only ever streams the caller's x once.
    x = x_ref[...].astype(jnp.bfloat16)
    # Layer 1: (TB, 784) @ (784, 128) + b1, ReLU.  bf16 operands, f32 accum.
    h1 = jnp.dot(x, w1_ref[...], preferred_element_type=jnp.float32)
    h1 = jnp.maximum(h1 + b1_ref[...], 0.0)
    # Layer 2: (TB, 128) @ (128, 256) + b2, ReLU.
    h2 = jnp.dot(h1.astype(jnp.bfloat16), w2_ref[...],
                 preferred_element_type=jnp.float32)
    h2 = jnp.maximum(h2 + b2_ref[...], 0.0)
    # Output layer: (TB, 256) @ (256, OUT_PAD) + b3 (padded cols are zero).
    logits = jnp.dot(h2.astype(jnp.bfloat16), w3_ref[...],
                     preferred_element_type=jnp.float32)
    o_ref[...] = (logits + b3_ref[...]).astype(o_ref.dtype)


def prepare_params(w1, b1, w2, b2, w3, b3):
    """One-time model prep: cast weights to bf16, pad the 10-wide output layer
    to 128 lanes. Call once, reuse across forward calls."""
    w1p = w1.astype(jnp.bfloat16)                                   # (784, 128)
    w2p = w2.astype(jnp.bfloat16)                                   # (128, 256)
    w3p = jnp.zeros((H2, OUT_PAD), jnp.bfloat16).at[:, :OUT].set(
        w3.astype(jnp.bfloat16))                                    # (256, 128)
    b1p = b1.reshape(1, H1).astype(jnp.float32)
    b2p = b2.reshape(1, H2).astype(jnp.float32)
    b3p = jnp.zeros((1, OUT_PAD), jnp.float32).at[:, :OUT].set(
        b3.reshape(1, OUT).astype(jnp.float32))
    return (w1p, b1p, w2p, b2p, w3p, b3p)


@functools.partial(jax.jit, static_argnames=("tb",))
def mnist_nn_forward(x, params, *, tb=2048):
    """x: (B, 784) f32 (or bf16). params: output of prepare_params.
    Returns (B, 10) f32 logits."""
    w1p, b1p, w2p, b2p, w3p, b3p = params
    B = x.shape[0]

    # Batch tiling: at least ceil(B/tb) tiles; force >=2 tiles for non-tiny
    # batches so v7x megacore can split the grid. Tile rounded to sublanes (8);
    # the ragged tail (if any) is handled by Pallas' masked edge blocks.
    n_tiles = max(1, pl.cdiv(B, tb))
    if B >= 16:
        n_tiles = max(n_tiles, 2)
    TB = _round_up(pl.cdiv(B, n_tiles), 8)
    grid = (pl.cdiv(B, TB),)

    flops = 2 * B * (IN * H1 + H1 * H2 + H2 * OUT_PAD)
    bytes_accessed = (x.size * x.dtype.itemsize
                      + (w1p.size + w2p.size + w3p.size) * 2
                      + (b1p.size + b2p.size + b3p.size) * 4
                      + B * OUT_PAD * 2)

    out_padded = pl.pallas_call(
        mlp_kernel,
        out_shape=jax.ShapeDtypeStruct((B, OUT_PAD), jnp.bfloat16),
        grid=grid,
        in_specs=[
            pl.BlockSpec((TB, IN), lambda i: (i, 0)),        # x: tiled over batch
            pl.BlockSpec((IN, H1), lambda i: (0, 0)),        # weights/biases resident
            pl.BlockSpec((1, H1), lambda i: (0, 0)),
            pl.BlockSpec((H1, H2), lambda i: (0, 0)),
            pl.BlockSpec((1, H2), lambda i: (0, 0)),
            pl.BlockSpec((H2, OUT_PAD), lambda i: (0, 0)),
            pl.BlockSpec((1, OUT_PAD), lambda i: (0, 0)),
        ],
        out_specs=pl.BlockSpec((TB, OUT_PAD), lambda i: (i, 0)),
        compiler_params=pltpu.CompilerParams(
            dimension_semantics=("parallel",),
            vmem_limit_bytes=48 << 20,
        ),
        cost_estimate=pl.CostEstimate(
            flops=flops, transcendentals=0, bytes_accessed=bytes_accessed),
    )(x, w1p, b1p, w2p, b2p, w3p, b3p)

    return out_padded[:, :OUT].astype(jnp.float32)


def init_linear(key, fan_in, fan_out):
    # Mimic PyTorch nn.Linear default init: U(-1/sqrt(fan_in), 1/sqrt(fan_in)).
    kw, kb = jax.random.split(key)
    bound = 1.0 / jnp.sqrt(jnp.float32(fan_in))
    w = jax.random.uniform(kw, (fan_in, fan_out), jnp.float32, -bound, bound)
    b = jax.random.uniform(kb, (1, fan_out), jnp.float32, -bound, bound)
    return w, b


if __name__ == "__main__":
    key = jax.random.PRNGKey(0)
    kx, k1, k2, k3 = jax.random.split(key, 4)

    B = 16  # small batch; exercises a 2-step grid with resident weights
    x = jax.random.normal(kx, (B, 784), jnp.float32)

    w1, b1 = init_linear(k1, 784, 128)
    w2, b2 = init_linear(k2, 128, 256)
    w3, b3 = init_linear(k3, 256, 10)

    params = prepare_params(w1, b1, w2, b2, w3, b3)
    out = mnist_nn_forward(x, params)
    out = jax.block_until_ready(out)
    assert out.shape == (B, 10)

    # Pure-JAX reference at the same (bf16-operand / f32-accum) precision.
    xb = x.astype(jnp.bfloat16)
    h1 = jnp.maximum(
        jnp.dot(xb, w1.astype(jnp.bfloat16),
                preferred_element_type=jnp.float32) + b1, 0.0)
    h2 = jnp.maximum(
        jnp.dot(h1.astype(jnp.bfloat16), w2.astype(jnp.bfloat16),
                preferred_element_type=jnp.float32) + b2, 0.0)
    ref = jnp.dot(h2.astype(jnp.bfloat16), w3.astype(jnp.bfloat16),
                  preferred_element_type=jnp.float32) + b3
    err = jnp.max(jnp.abs(out - ref))
    assert jnp.allclose(out, ref, atol=2e-2, rtol=2e-2), f"max abs err {err}"

    # Sanity check against the full-f32 PyTorch-equivalent forward.
    ref32 = jnp.maximum(x @ w1 + b1, 0.0)
    ref32 = jnp.maximum(ref32 @ w2 + b2, 0.0)
    ref32 = ref32 @ w3 + b3
    err32 = jnp.max(jnp.abs(out - ref32))
    assert jnp.allclose(out, ref32, atol=1e-1, rtol=1e-1), f"max abs err {err32}"

    print("KERNEL_OK")
</pallas_src>

<mosaic_0001>
module attributes {stable_mosaic.version = 11 : i64} {
  func.func @mlp_kernel(%arg0: i32, %arg1: memref<8x784xf32, #tpu.memory_space<vmem>>, %arg2: memref<784x128xbf16, #tpu.memory_space<vmem>>, %arg3: memref<1x128xf32, #tpu.memory_space<vmem>>, %arg4: memref<128x256xbf16, #tpu.memory_space<vmem>>, %arg5: memref<1x256xf32, #tpu.memory_space<vmem>>, %arg6: memref<256x128xbf16, #tpu.memory_space<vmem>>, %arg7: memref<1x128xf32, #tpu.memory_space<vmem>>, %arg8: memref<8x128xbf16, #tpu.memory_space<vmem>>) attributes {dimension_semantics = [#tpu.dimension_semantics<parallel>], iteration_bounds = array<i64: 2>, scalar_prefetch = 0 : i64, scratch_operands = 0 : i64, tpu.core_type = #tpu.core_type<tc>, window_params = [{transform_indices = @transform_0, window_bounds = array<i64: 8, 784>}, {pipeline_mode = #tpu.pipeline_mode<synchronous>, transform_indices = @transform_1, window_bounds = array<i64: 784, 128>}, {pipeline_mode = #tpu.pipeline_mode<synchronous>, transform_indices = @transform_2, window_bounds = array<i64: 1, 128>}, {pipeline_mode = #tpu.pipeline_mode<synchronous>, transform_indices = @transform_3, window_bounds = array<i64: 128, 256>}, {pipeline_mode = #tpu.pipeline_mode<synchronous>, transform_indices = @transform_4, window_bounds = array<i64: 1, 256>}, {pipeline_mode = #tpu.pipeline_mode<synchronous>, transform_indices = @transform_5, window_bounds = array<i64: 256, 128>}, {pipeline_mode = #tpu.pipeline_mode<synchronous>, transform_indices = @transform_6, window_bounds = array<i64: 1, 128>}, {transform_indices = @transform_7, window_bounds = array<i64: 8, 128>}]} {
    %c0 = arith.constant 0 : index
    %c0_0 = arith.constant 0 : index
    %0 = vector.load %arg1[%c0, %c0_0] : memref<8x784xf32, #tpu.memory_space<vmem>>, vector<8x784xf32>
    %1 = arith.truncf %0 : vector<8x784xf32> to vector<8x784xbf16>
    %c0_1 = arith.constant 0 : index
    %c0_2 = arith.constant 0 : index
    %2 = vector.load %arg2[%c0_1, %c0_2] : memref<784x128xbf16, #tpu.memory_space<vmem>>, vector<784x128xbf16>
    %cst = arith.constant dense<0.000000e+00> : vector<8x128xf32>
    %3 = tpu.matmul %1, %2, %cst {dimension_numbers = #tpu.dot_dimension_numbers<[1], [0], [0], [1], [0, 0, 1, 1], [], []>} : vector<8x784xbf16>, vector<784x128xbf16>, vector<8x128xf32> -> vector<8x128xf32>
    %c0_3 = arith.constant 0 : index
    %c0_4 = arith.constant 0 : index
    %4 = vector.load %arg3[%c0_3, %c0_4] : memref<1x128xf32, #tpu.memory_space<vmem>>, vector<1x128xf32>
    %5 = vector.broadcast %4 : vector<1x128xf32> to vector<8x128xf32>
    %6 = arith.addf %3, %5 : vector<8x128xf32>
    %cst_5 = arith.constant 0.000000e+00 : f32
    %7 = vector.broadcast %cst_5 : f32 to vector<8x128xf32>
    %8 = arith.maximumf %6, %7 : vector<8x128xf32>
    %9 = arith.truncf %8 : vector<8x128xf32> to vector<8x128xbf16>
    %c0_6 = arith.constant 0 : index
    %c0_7 = arith.constant 0 : index
    %10 = vector.load %arg4[%c0_6, %c0_7] : memref<128x256xbf16, #tpu.memory_space<vmem>>, vector<128x256xbf16>
    %cst_8 = arith.constant dense<0.000000e+00> : vector<8x256xf32>
    %11 = tpu.matmul %9, %10, %cst_8 {dimension_numbers = #tpu.dot_dimension_numbers<[1], [0], [0], [1], [0, 0, 1, 1], [], []>} : vector<8x128xbf16>, vector<128x256xbf16>, vector<8x256xf32> -> vector<8x256xf32>
    %c0_9 = arith.constant 0 : index
    %c0_10 = arith.constant 0 : index
    %12 = vector.load %arg5[%c0_9, %c0_10] : memref<1x256xf32, #tpu.memory_space<vmem>>, vector<1x256xf32>
    %13 = vector.broadcast %12 : vector<1x256xf32> to vector<8x256xf32>
    %14 = arith.addf %11, %13 : vector<8x256xf32>
    %cst_11 = arith.constant 0.000000e+00 : f32
    %15 = vector.broadcast %cst_11 : f32 to vector<8x256xf32>
    %16 = arith.maximumf %14, %15 : vector<8x256xf32>
    %17 = arith.truncf %16 : vector<8x256xf32> to vector<8x256xbf16>
    %c0_12 = arith.constant 0 : index
    %c0_13 = arith.constant 0 : index
    %18 = vector.load %arg6[%c0_12, %c0_13] : memref<256x128xbf16, #tpu.memory_space<vmem>>, vector<256x128xbf16>
    %cst_14 = arith.constant dense<0.000000e+00> : vector<8x128xf32>
    %19 = tpu.matmul %17, %18, %cst_14 {dimension_numbers = #tpu.dot_dimension_numbers<[1], [0], [0], [1], [0, 0, 1, 1], [], []>} : vector<8x256xbf16>, vector<256x128xbf16>, vector<8x128xf32> -> vector<8x128xf32>
    %c0_15 = arith.constant 0 : index
    %c0_16 = arith.constant 0 : index
    %20 = vector.load %arg7[%c0_15, %c0_16] : memref<1x128xf32, #tpu.memory_space<vmem>>, vector<1x128xf32>
    %21 = vector.broadcast %20 : vector<1x128xf32> to vector<8x128xf32>
    %22 = arith.addf %19, %21 : vector<8x128xf32>
    %23 = arith.truncf %22 : vector<8x128xf32> to vector<8x128xbf16>
    %c0_17 = arith.constant 0 : index
    %c0_18 = arith.constant 0 : index
    %24 = vector.load %arg8[%c0_17, %c0_18] : memref<8x128xbf16, #tpu.memory_space<vmem>>, vector<8x128xbf16>
    tpu.vector_store %arg8[%c0_17, %c0_18], %23 {strides = array<i32>} : memref<8x128xbf16, #tpu.memory_space<vmem>>, vector<8x128xbf16>,
    return
  }
  func.func @transform_0(%arg0: i32) -> (i32, i32) {
    %c0_i32 = arith.constant 0 : i32
    %c0_i32_0 = arith.constant 0 : i32
    return %arg0, %c0_i32 : i32, i32
  }
  func.func @transform_1(%arg0: i32) -> (i32, i32) {
    %c0_i32 = arith.constant 0 : i32
    %c0_i32_0 = arith.constant 0 : i32
    %c0_i32_1 = arith.constant 0 : i32
    return %c0_i32, %c0_i32_0 : i32, i32
  }
  func.func @transform_2(%arg0: i32) -> (i32, i32) {
    %c0_i32 = arith.constant 0 : i32
    %c0_i32_0 = arith.constant 0 : i32
    %c0_i32_1 = arith.constant 0 : i32
    return %c0_i32, %c0_i32_0 : i32, i32
  }
  func.func @transform_3(%arg0: i32) -> (i32, i32) {
    %c0_i32 = arith.constant 0 : i32
    %c0_i32_0 = arith.constant 0 : i32
    %c0_i32_1 = arith.constant 0 : i32
    return %c0_i32, %c0_i32_0 : i32, i32
  }
  func.func @transform_4(%arg0: i32) -> (i32, i32) {
    %c0_i32 = arith.constant 0 : i32
    %c0_i32_0 = arith.constant 0 : i32
    %c0_i32_1 = arith.constant 0 : i32
    return %c0_i32, %c0_i32_0 : i32, i32
  }
  func.func @transform_5(%arg0: i32) -> (i32, i32) {
    %c0_i32 = arith.constant 0 : i32
    %c0_i32_0 = arith.constant 0 : i32
    %c0_i32_1 = arith.constant 0 : i32
    return %c0_i32, %c0_i32_0 : i32, i32
  }
  func.func @transform_6(%arg0: i32) -> (i32, i32) {
    %c0_i32 = arith.constant 0 : i32
    %c0_i32_0 = arith.constant 0 : i32
    %c0_i32_1 = arith.constant 0 : i32
    return %c0_i32, %c0_i32_0 : i32, i32
  }
  func.func @transform_7(%arg0: i32) -> (i32, i32) {
    %c0_i32 = arith.constant 0 : i32
    %c0_i32_0 = arith.constant 0 : i32
    return %arg0, %c0_i32 : i32, i32
  }
}

</mosaic_0001>

<bundles_post_ra>
// kernel: mnist_nn_forward.1
= control target key start
LH: loop header
LB: loop body
LE: loop exit
PB: predicated region body
PF: predicated region fallthrough
CT: control target
= control target key end

     0   :  { %12 = vsyncpa [#allocation3], 0  ;;  %s2133_s0 = inlined_call_operand.hbm [shape: f32[16,784], index: 0, kind: input, shape index: {}]   ;;  %s2134_s1 = inlined_call_operand.hbm [shape: bf16[784,128], index: 1, kind: input, shape index: {}]   ;;  %s2135_s2 = inlined_call_operand.vmem [shape: f32[1,128], index: 2, kind: input, shape index: {}]   ;;  %s2136_s3 = inlined_call_operand.hbm [shape: bf16[128,256], index: 3, kind: input, shape index: {}]   ;;  %s2137_s4 = inlined_call_operand.vmem [shape: f32[1,256], index: 4, kind: input, shape index: {}]   ;;  %s2138_s5 = inlined_call_operand.hbm [shape: bf16[256,128], index: 5, kind: input, shape index: {}]   ;;  %s2139_s6 = inlined_call_operand.vmem [shape: f32[1,128], index: 6, kind: input, shape index: {}]   ;;  %s2140_s7 = inlined_call_operand.vmem [shape: bf16[16,128], index: 7, kind: output, shape index: {}]  }
   0x1   :  { %14 = vsyncpa [#allocation3 + $0x1], 0 }
   0x2   :  { %15 = vsyncpa [#allocation5], 0 }
   0x3   :  { %16 = vsyncpa [#allocation8], 0  ;;  %s1915_s24 = smov 0   ;;  %s1917_s25 = smov 0  }
   0x4   :  { %s1919_s26 = smov 0   ;;  %s1921_s27 = smov 0  }
   0x5 LB: > { %s1934_s28 = sadd.s32 4294967295, %s1862_s27   ;;  %p42_p0 = scmp.ne.s32.totalorder %s1854_s25, %s1850_s24  ;;  %s1862_s27 = sphi %s1921_s27, %s2162_s27   ;;  %s1858_s26 = sphi %s1919_s26, %s2161_s26   ;;  %s1854_s25 = sphi %s1917_s25, %s2160_s25   ;;  %s1850_s24 = sphi %s1915_s24, %s2159_s24  }
   0x6   : > { %p2141_p1 = scmp.eq.s32.totalorder %s1934_s28, 0  ;;  %p1344_p2 = scmp.ge.s32.totalorder %s1862_s27, 1 }
   0x7   : > { %p205_p3 = scmp.lt.s32.totalorder %s1862_s27, 3  ;;  %s1864_s8 = smov [#allocation4]  }
   0x8   : > { %p1942_p4 = por %p2141_p1, %p42_p0  ;;  %s217_s9 = sshll.u32 %s1864_s8, 4  ;;  %s218_s9 = int_to_ptr.vmem [resolvable:$true] %s217_s9 }
   0x9   : > { %p1946_p5 = pnand %p1344_p2, %p205_p3  ;;  %s1865_s11 = smov [#allocation6]  }
   0xa   : > { %s2146_s29 = scalar_select %p1942_p4, 1, 0 }
   0xb   : > { %s2147_s30 = scalar_select %p1946_p5, 1, 0 }
   0xc   : > { %p1554_p6 = pneg %p1946_p5  ;;  %s233_s12 = sshll.u32 %s1865_s11, 4  ;;  %s1958_s12 = int_to_ptr.vmem [resolvable:$true] %s233_s12 }
   0xd   : > { %s1706_s15 = scalar_lea.hbm %s2134_s1, 6272 }
   0xe   : > { %p1954_p7 = pnand %p1554_p6, %p2141_p1  ;;  %p1707_p8 = scmp.ne.s32.totalorder %s2134_s1, %s1706_s15 }
   0xf   : > { %p1713_p12 = scmp.lt.u32.totalorder %s1706_s15, %s2134_s1 }
  0x10   : > { %p1968_p9 = pneg %p1954_p7 }
  0x12   : > { %p1709_p10 = pnand %p1968_p9, %p1707_p8 }
  0x14   : > { %p1710_p11 = pneg %p1709_p10 }
  0x16   : > { %p1715_p13 = pnand %p1713_p12, %p1710_p11 }
  0x18   : > { %1718 = shalt.err (!%p1715_p13)
}
  0x19   : > { %s1719_s21 = scalar_lea.vmem %s218_s9, 6272  ;;  %p1727_p6 = scmp.lt.s32.totalorder %s218_s9, %s218_s9 }
  0x1a   : > { %p1720_p0 = scmp.ne.s32.totalorder %s218_s9, %s1719_s21  ;;  %p1728_p1 = scmp.lt.s32.totalorder %s1719_s21, %s1719_s21 }
  0x1c   : > { %p1722_p2 = pnand %p1720_p0, %p1968_p9  ;;  %p1729_p4 = por %p1728_p1, %p1727_p6 }
  0x1e   : > { %p1723_p3 = pneg %p1722_p2 }
  0x20   : > { %p1730_p5 = pnand %p1729_p4, %p1723_p3 }
  0x22   : > { %1733 = shalt.err (!%p1730_p5)
}
  0x23   : > { %s2144_s22 = smov 64   ;;  %s2145_s23 = smov 4  }
  0x24   : > { %1557 = dma.hbm_to_vmem [thread:$0]  (!%p1954_p7), %s2134_s1, 6272, %s218_s9, [#allocation5], %s2144_s22, %s2144_s22, %s2145_s23  }
  0x25   : > { %s1734_s14 = scalar_lea.hbm %s2136_s3, 2048 }
  0x26   : > { %p1735_p1 = scmp.ne.s32.totalorder %s2136_s3, %s1734_s14  ;;  %p1741_p8 = scmp.lt.u32.totalorder %s1734_s14, %s2136_s3 }
  0x28   : > { %p1737_p4 = pnand %p1735_p1, %p1968_p9 }
  0x2a   : > { %p1738_p5 = pneg %p1737_p4 }
  0x2c   : > { %p1743_p10 = pnand %p1741_p8, %p1738_p5 }
  0x2e   : > { %1746 = shalt.err (!%p1743_p10)
}
  0x2f   : > { %s1747_s9 = scalar_lea.vmem %s1958_s12, 2048  ;;  %p1755_p0 = scmp.lt.s32.totalorder %s1958_s12, %s1958_s12 }
  0x30   : > { %p1748_p11 = scmp.ne.s32.totalorder %s1958_s12, %s1747_s9  ;;  %p1756_p2 = scmp.lt.s32.totalorder %s1747_s9, %s1747_s9 }
  0x32   : > { %p1750_p12 = pnand %p1748_p11, %p1968_p9  ;;  %p1757_p3 = por %p1756_p2, %p1755_p0 }
  0x34   : > { %p1751_p13 = pneg %p1750_p12 }
  0x36   : > { %p1758_p6 = pnand %p1757_p3, %p1751_p13 }
  0x38   : > { %1761 = shalt.err (!%p1758_p6)
}
  0x39   : > { %s1868_s20 = smov 128   ;;  %s1869_s21 = smov 8  }
  0x3a   : > { %1560 = dma.hbm_to_vmem [thread:$0]  (!%p1954_p7), %s2136_s3, 2048, %s1958_s12, [#allocation5], %s1868_s20, %s1868_s20, %s1869_s21  }
  0x3b   : > { %s1870_s11 = smov [#allocation7]   ;;  %s2011_s14 = sadd.s32 1, %s1862_s27  }
  0x3c   : > { %s249_s13 = sshll.u32 %s1870_s11, 4  ;;  %s1762_s17 = scalar_lea.hbm %s2138_s5, 2048  ;;  %s250_s13 = int_to_ptr.vmem [resolvable:$true] %s249_s13 }
  0x3d   : > { %p1763_p1 = scmp.ne.s32.totalorder %s2138_s5, %s1762_s17  ;;  %p1769_p8 = scmp.lt.u32.totalorder %s1762_s17, %s2138_s5 }
  0x3f   : > { %p1765_p4 = pnand %p1763_p1, %p1968_p9 }
  0x41   : > { %p1766_p5 = pneg %p1765_p4 }
  0x43   : > { %p1771_p10 = pnand %p1769_p8, %p1766_p5 }
  0x45   : > { %1774 = shalt.err (!%p1771_p10)
}
  0x46   : > { %s1775_s12 = scalar_lea.vmem %s250_s13, 2048  ;;  %p1783_p0 = scmp.lt.s32.totalorder %s250_s13, %s250_s13 }
  0x47   : > { %p1776_p11 = scmp.ne.s32.totalorder %s250_s13, %s1775_s12  ;;  %p1784_p2 = scmp.lt.s32.totalorder %s1775_s12, %s1775_s12 }
  0x49   : > { %p1778_p12 = pnand %p1776_p11, %p1968_p9  ;;  %p1785_p3 = por %p1784_p2, %p1783_p0 }
  0x4b   : > { %p1779_p13 = pneg %p1778_p12 }
  0x4d   : > { %p1786_p6 = pnand %p1785_p3, %p1779_p13 }
  0x4f   : > { %1789 = shalt.err (!%p1786_p6)
}
  0x50   : > { %s2150_s20 = smov 4   ;;  %s2151_s21 = smov 64  }
  0x51   : > { %1563 = dma.hbm_to_vmem [thread:$0]  (!%p1954_p7), %s2138_s5, 2048, %s250_s13, [#allocation8], %s2151_s21, %s2151_s21, %s2150_s20  }
  0x52   : > { %s26_s18 = ssub.s32 %s1862_s27, %s2011_s14  ;;  %s29_s24 = sadd.s32 1, %s1858_s26 }
  0x53   : > { %p27_p9 = scmp.eq.s32.totalorder %s26_s18, 0  ;;  %p36_p1 = scmp.ne.s32.totalorder %s1858_s26, %s1854_s25 }
  0x54   : > { %p37_p4 = scmp.eq.s32.totalorder %s1862_s27, 0  ;;  %p1571_p5 = scmp.lt.s32.totalorder %s1862_s27, 2 }
  0x55   : > { %s2042_s10 = scalar_select %p27_p9, %s1858_s26, %s29_s24  }
  0x56   : > { %p38_p8 = por %p37_p4, %p36_p1  ;;  %s266_s8 = sand.u32 1, %s1858_s26  }
  0x57   : > { %s1537_s11 = smul.u32 56, %s266_s8  ;;  %s1795_s23 = scalar_lea.hbm %s2133_s0, 1792 }
  0x58   : > { %s1538_s15 = smul.u32 896, %s1862_s27  ;;  %p2046_p10 = pnand %p1571_p5, %p38_p8 }
  0x59   : > { %s270_s9 = scalar_lea.vmem [#allocation2], %s1537_s11  ;;  %s267_s27 = scalar_lea.sflag [#allocation3], %s266_s8 }
  0x5a   : > { %s2053_s13 = scalar_lea.hbm %s2133_s0, %s1538_s15  ;;  %s278_s12 = sshll.u32 %s270_s9, 4  ;;  %s2055_s12 = int_to_ptr.vmem [resolvable:$true] %s278_s12 }
  0x5b   : > { %s1790_s20 = scalar_lea.hbm %s2053_s13, 896  ;;  %p1792_p11 = pneg %p2046_p10 }
  0x5c   : > { %p1791_p7 = scmp.ne.s32.totalorder %s2053_s13, %s1790_s20  ;;  %p1796_p0 = scmp.lt.u32.totalorder %s2053_s13, %s2133_s0 }
  0x5d   : > { %p1797_p2 = scmp.lt.u32.totalorder %s1795_s23, %s1790_s20  ;;  %p1799_p6 = scmp.lt.u32.totalorder %s1790_s20, %s2053_s13 }
  0x5e   : > { %p1793_p12 = pnand %p1792_p11, %p1791_p7 }
  0x5f   : > { %p1798_p3 = por %p1797_p2, %p1796_p0 }
  0x60   : > { %p1794_p13 = pneg %p1793_p12 }
  0x61   : > { %p1800_p9 = por %p1799_p6, %p1798_p3 }
  0x63   : > { %p1801_p1 = pnand %p1800_p9, %p1794_p13 }
  0x65   : > { %1804 = shalt.err (!%p1801_p1)
}
  0x66   : > { %s1805_s8 = scalar_lea.vmem %s2055_s12, 896  ;;  %s1871_s11 = smov [#allocation2]  }
  0x67   : > { %p1806_p4 = scmp.ne.s32.totalorder %s2055_s12, %s1805_s8  ;;  %s1810_s15 = sshll.u32 %s1871_s11, 4  ;;  %s1811_s15 = int_to_ptr.vmem [resolvable:$false] %s1810_s15 }
  0x68   : > { %s1812_s17 = scalar_lea.vmem %s1811_s15, 1792  ;;  %p1813_p7 = scmp.lt.s32.totalorder %s2055_s12, %s1811_s15 }
  0x69   : > { %p1808_p5 = pnand %p1806_p4, %p1792_p11  ;;  %p1814_p12 = scmp.lt.s32.totalorder %s1812_s17, %s1805_s8 }
  0x6b   : > { %p1809_p8 = pneg %p1808_p5  ;;  %p1815_p0 = por %p1814_p12, %p1813_p7 }
  0x6d   : > { %p1816_p2 = pnand %p1815_p0, %p1809_p8 }
  0x6f   : > { %1819 = shalt.err (!%p1816_p2)
}
  0x70   : > { %1567 = dma.hbm_to_vmem [thread:$0]  (!%p2046_p10), %s2053_s13, 896, %s2055_s12, %s267_s27  }
  0x71   : > { %p2153_p13 = scmp.ne.s32.totalorder %s2147_s30, 0 }
  0x72   : > { %s289_s19 = sand.u32 (!%p2153_p13), 1, %s1854_s25   ;;  %p2154_p11 = scmp.ne.s32.totalorder (!%p2153_p13), %s2146_s29, 0 }
  0x73   : > { %287 = sbr.rel (%p2153_p13) target bundleno = 857 (0x359), region = 48  ;;  %s290_s20 = scalar_lea.sflag (!%p2153_p13), [#allocation3], %s289_s19 }
  0x74   : > { %s1539_s9 = smul.u32 (!%p2153_p13), 56, %s289_s19 }
  0x76   : > { %s2085_s21 = scalar_lea.vmem (!%p2153_p13), [#allocation2], %s1539_s9 }
  0x7a   : > { %1837 = dma.done.wait (%p2154_p11), %s290_s20, 896  }
  0x7b   : > { %1839 = vsyncadd (%p2154_p11), %s290_s20, 4294966400  ;;  %p2155_p3 = scmp.eq.s32.totalorder %s1934_s28, 0 }
  0x7d   : > { %1841 = dma.done.wait (%p2155_p3), [#allocation5], 8320   ;;  %p2156_p10 = pmov %p2155_p3 }
  0x7e   : > { %p2157_p6 = pmov %p2155_p3 }
  0x7f   : > { %1843 = vsyncadd (%p2156_p10), [#allocation5], 4294958976 }
  0x80   : > { %1845 = dma.done.wait (%p2157_p6), [#allocation8], 2048   ;;  %p2158_p9 = pmov %p2155_p3 }
  0x81   : > { %v1617_v0 = vld [vmem:[#allocation4 + $0x40] sm:$0xff]   ;;  %v1621_v4 = vld [vmem:[#allocation4 + $0x48] sm:$0xff]   ;;  %v1625_v8 = vld [vmem:[#allocation4 + $0x50] sm:$0xff]   ;;  %v1872_v44 = vmov 0.0   ;;  %vm1873_vm0 = vmmov 0   ;;  %vm753_vm1 = vcmask 130048  }
  0x82   : > { %1847 = vsyncadd (%p2158_p9), [#allocation8], 4294965248  ;;  %v1618_v1 = vld [vmem:[#allocation4] sm:$0xff]   ;;  %1441 = vmatprep.subr.bf16.mxu0 %v1617_v0  ;;  %v1622_v5 = vld [vmem:[#allocation4 + $0x8] sm:$0xff]   ;;  %p335_p1 = scmp.lt.s32.totalorder %s1934_s28, 1 }
  0x83   : > { %v1619_v2 = vld [vmem:[#allocation4 + $0xc0] sm:$0xff]   ;;  %1442 = vmatpush3.bf16.msra.mxu0 %v1618_v1  ;;  %v1623_v6 = vld [vmem:[#allocation4 + $0xc8] sm:$0xff]   ;;  %v1626_v9 = vld [vmem:[#allocation4 + $0x10] sm:$0xff]  }
  0x84   : > { %v1620_v3 = vld [vmem:[#allocation4 + $0x80] sm:$0xff]   ;;  %1463 = vmatprep.subr.bf16.mxu1 %v1619_v2  ;;  %1443 = vmatprep.subr.bf16.mxu0 %v1621_v4  ;;  %v1624_v7 = vld [vmem:[#allocation4 + $0x88] sm:$0xff]   ;;  %v1627_v10 = vld [vmem:[#allocation4 + $0xd0] sm:$0xff]   ;;  %s2164_s28 = smov (!%p335_p1, %s1934_s28), 1 }
  0x85   : > { %1464 = vmatpush3.bf16.msra.mxu1 %v1620_v3  ;;  %v1628_v11 = vld [vmem:[#allocation4 + $0x90] sm:$0xff]   ;;  %v1629_v12 = vld [vmem:[#allocation4 + $0x58] sm:$0xff]   ;;  %v1633_v16 = vld [vmem:[#allocation4 + $0x60] sm:$0xff]   ;;  %s1354_s22 = sshll.u32 %s2164_s28, 2 }
  0x86   : > { %1465 = vmatprep.subr.bf16.mxu1 %v1623_v6  ;;  %v1630_v13 = vld [vmem:[#allocation4 + $0x18] sm:$0xff]   ;;  %v1634_v17 = vld [vmem:[#allocation4 + $0x20] sm:$0xff]   ;;  %v1637_v20 = vld [vmem:[#allocation4 + $0x68] sm:$0xff]   ;;  %s338_s24 = scalar_lea.vmem %s2140_s7, %s1354_s22 }
  0x87   : > { %1444 = vmatpush3.bf16.msra.mxu0 %v1622_v5  ;;  %v1631_v14 = vld [vmem:[#allocation4 + $0xd8] sm:$0xff]   ;;  %v1635_v18 = vld [vmem:[#allocation4 + $0xe0] sm:$0xff]   ;;  %v1638_v21 = vld [vmem:[#allocation4 + $0x28] sm:$0xff]  }
  0x88   : > { %1445 = vmatprep.subr.bf16.mxu0 %v1625_v8  ;;  %v1632_v15 = vld [vmem:[#allocation4 + $0x98] sm:$0xff]   ;;  %v1636_v19 = vld [vmem:[#allocation4 + $0xa0] sm:$0xff]   ;;  %v1639_v22 = vld [vmem:[#allocation4 + $0xe8] sm:$0xff]  }
  0x89   : > { %1466 = vmatpush3.bf16.msra.mxu1 %v1624_v7  ;;  %v1640_v23 = vld [vmem:[#allocation4 + $0xa8] sm:$0xff]   ;;  %v1641_v24 = vld [vmem:[#allocation4 + $0x70] sm:$0xff]   ;;  %v1645_v28 = vld [vmem:[#allocation4 + $0x78] sm:$0xff]  }
  0x8a   : > { %1467 = vmatprep.subr.bf16.mxu1 %v1627_v10  ;;  %v1642_v25 = vld [vmem:[#allocation4 + $0x30] sm:$0xff]   ;;  %v1646_v29 = vld [vmem:[#allocation4 + $0x38] sm:$0xff]   ;;  %v1649_v36 = vld [vmem:[#allocation4 + $0x140] sm:$0xff]  }
  0x8b   : > { %1446 = vmatpush3.bf16.msra.mxu0 %v1626_v9  ;;  %v1643_v26 = vld [vmem:[#allocation4 + $0xf0] sm:$0xff]   ;;  %v1647_v30 = vld [vmem:[#allocation4 + $0xf8] sm:$0xff]   ;;  %v343_v37 = vld [vmem:[%s2085_s21 + $0x18] sm:$0xff] }
  0x8c   : > { %1447 = vmatprep.subr.bf16.mxu0 %v1629_v12  ;;  %v1644_v27 = vld [vmem:[#allocation4 + $0xb0] sm:$0xff]   ;;  %v1648_v33 = vld [vmem:[#allocation4 + $0xb8] sm:$0xff]   ;;  %v350_v38 = vpack.c.bf16 %v343_v37, %v343_v37  ;;  %v1650_v39 = vld [vmem:[#allocation4 + $0x100] sm:$0xff]  }
  0x8d   : > { %1468 = vmatpush3.bf16.msra.mxu1 %v1628_v11  ;;  %v341_v31 = vld [vmem:[%s2085_s21 + $0x8] sm:$0xff]  ;;  %v340_v34 = vld [vmem:[%s2085_s21] sm:$0xff]  ;;  %v342_v40 = vld [vmem:[%s2085_s21 + $0x10] sm:$0xff] }
  0x8e   : > { %1469 = vmatprep.subr.bf16.mxu1 %v1631_v14  ;;  %v348_v32 = vpack.c.bf16 %v341_v31, %v341_v31  ;;  %v347_v35 = vpack.c.bf16 %v340_v34, %v340_v34  ;;  %829 = vmatprep.mubr.bf16.mxu1 %v350_v38  ;;  %v349_v41 = vpack.c.bf16 %v342_v40, %v342_v40  ;;  %v1651_v42 = vld [vmem:[#allocation4 + $0x148] sm:$0xff]   ;;  %v1653_v45 = vld [vmem:[#allocation4 + $0x150] sm:$0xff]   ;;  %v1655_v47 = vld [vmem:[#allocation4 + $0x158] sm:$0xff]  }
  0x8f   : > { %1448 = vmatpush3.bf16.msra.mxu0 %v1630_v13  ;;  %v1652_v43 = vld [vmem:[#allocation4 + $0x108] sm:$0xff]   ;;  %v1654_v46 = vld [vmem:[#allocation4 + $0x110] sm:$0xff]   ;;  %v1656_v48 = vld [vmem:[#allocation4 + $0x118] sm:$0xff]  }
  0x90   : > { %1449 = vmatprep.subr.bf16.mxu0 %v1633_v16  ;;  %789 = vmatprep.mubr.bf16.mxu0 %v348_v32  ;;  %v1657_v49 = vld [vmem:[#allocation4 + $0x160] sm:$0xff]   ;;  %v1659_v51 = vld [vmem:[#allocation4 + $0x168] sm:$0xff]   ;;  %v345_v54 = vld [vmem:[%s2085_s21 + $0x28] sm:$0xff]  ;;  %v1874_v16 = vmov 0  }
  0x91   : > { %1470 = vmatpush3.bf16.msra.mxu1 %v1632_v15  ;;  %v1658_v50 = vld [vmem:[#allocation4 + $0x120] sm:$0xff]   ;;  %v1660_v52 = vld [vmem:[#allocation4 + $0x128] sm:$0xff]   ;;  %v1661_v55 = vld [vmem:[#allocation4 + $0x170] sm:$0xff]   ;;  %v352_v56 = vpack.c.bf16 %v345_v54, %v345_v54 }
  0x92   : > { %1471 = vmatprep.subr.bf16.mxu1 %v1635_v18  ;;  %v1665_v53 = vld [vmem:[#allocation4 + $0x180] sm:$0xff]   ;;  %v1662_v59 = vld [vmem:[#allocation4 + $0x130] sm:$0xff]   ;;  %v1663_v60 = vld [vmem:[#allocation4 + $0x178] sm:$0xff]  }
  0x93   : > { %1450 = vmatpush3.bf16.msra.mxu0 %v1634_v17  ;;  %v346_v57 = vld [vmem:[%s2085_s21 + $0x30] sm:$0xff]  ;;  %v344_v62 = vld [vmem:[%s2085_s21 + $0x20] sm:$0xff] }
  0x94   : > { %1451 = vmatprep.subr.bf16.mxu0 %v1637_v20  ;;  %v353_v58 = vpack.c.bf16 %v346_v57, %v346_v57  ;;  %v1664_v61 = vld [vmem:[#allocation4 + $0x138] sm:$0xff]   ;;  %v351_v63 = vpack.c.bf16 %v344_v62, %v344_v62  ;;  %v1666_v0 = vld [vmem:[#allocation6] ss:$8 sps:$4 sm:$0xff]   ;;  %v1668_v1 = vld [vmem:[#allocation6 + $0x4] ss:$8 sps:$4 sm:$0xff]  }
  0x95   : > { %1472 = vmatpush3.bf16.msra.mxu1 %v1636_v19  ;;  %v1671_v2 = vld [vmem:[#allocation6 + $0x14] ss:$8 sps:$4 sm:$0xff]   ;;  %v1669_v3 = vld [vmem:[#allocation6 + $0x10] ss:$8 sps:$4 sm:$0xff]   ;;  %v1674_v4 = vld [vmem:[#allocation6 + $0x24] ss:$8 sps:$4 sm:$0xff]  }
  0x96   : > { %1473 = vmatprep.subr.bf16.mxu1 %v1639_v22  ;;  %v1672_v5 = vld [vmem:[#allocation6 + $0x20] ss:$8 sps:$4 sm:$0xff]   ;;  %v1677_v6 = vld [vmem:[#allocation6 + $0x34] ss:$8 sps:$4 sm:$0xff]   ;;  %v1675_v7 = vld [vmem:[#allocation6 + $0x30] ss:$8 sps:$4 sm:$0xff]  }
  0x97   : > { %1452 = vmatpush3.bf16.msra.mxu0 %v1638_v21  ;;  %v1680_v8 = vld [vmem:[#allocation6 + $0x44] ss:$8 sps:$4 sm:$0xff]   ;;  %v1678_v9 = vld [vmem:[#allocation6 + $0x40] ss:$8 sps:$4 sm:$0xff]   ;;  %v1683_v10 = vld [vmem:[#allocation6 + $0x54] ss:$8 sps:$4 sm:$0xff]  }
  0x98   : > { %1453 = vmatprep.subr.bf16.mxu0 %v1641_v24  ;;  %v1681_v11 = vld [vmem:[#allocation6 + $0x50] ss:$8 sps:$4 sm:$0xff]   ;;  %v1686_v12 = vld [vmem:[#allocation6 + $0x64] ss:$8 sps:$4 sm:$0xff]   ;;  %v1684_v13 = vld [vmem:[#allocation6 + $0x60] ss:$8 sps:$4 sm:$0xff]  }
  0x99   : > { %1474 = vmatpush3.bf16.msra.mxu1 %v1640_v23  ;;  %v1689_v14 = vld [vmem:[#allocation6 + $0x74] ss:$8 sps:$4 sm:$0xff]   ;;  %v1687_v15 = vld [vmem:[#allocation6 + $0x70] ss:$8 sps:$4 sm:$0xff]   ;;  %v1690_v17 = vld [vmem:[#allocation7 + $0x40] sm:$0xff]  }
  0x9a   : > { %1475 = vmatprep.subr.bf16.mxu1 %v1643_v26  ;;  %v1691_v18 = vld [vmem:[#allocation7] sm:$0xff]   ;;  %v1692_v19 = vld [vmem:[#allocation7 + $0x48] sm:$0xff]   ;;  %v1694_v21 = vld [vmem:[#allocation7 + $0x50] sm:$0xff]  }
  0x9b   : > { %1454 = vmatpush3.bf16.msra.mxu0 %v1642_v25  ;;  %v1693_v20 = vld [vmem:[#allocation7 + $0x8] sm:$0xff]   ;;  %v1695_v22 = vld [vmem:[#allocation7 + $0x10] sm:$0xff]   ;;  %v1696_v23 = vld [vmem:[#allocation7 + $0x58] sm:$0xff]  }
  0x9c   : > { %1455 = vmatprep.subr.bf16.mxu0 %v1645_v28  ;;  %v1697_v24 = vld [vmem:[#allocation7 + $0x18] sm:$0xff]   ;;  %v1698_v25 = vld [vmem:[#allocation7 + $0x60] sm:$0xff]   ;;  %v1701_v28 = vld [vmem:[#allocation7 + $0x28] sm:$0xff]  }
  0x9d   : > { %1476 = vmatpush3.bf16.msra.mxu1 %v1644_v27  ;;  %v1699_v26 = vld [vmem:[#allocation7 + $0x20] sm:$0xff]   ;;  %v1700_v27 = vld [vmem:[#allocation7 + $0x68] sm:$0xff]   ;;  %v1704_v57 = vld [vmem:[#allocation7 + $0x78] sm:$0xff]  }
  0x9e   : > { %1477 = vmatprep.subr.bf16.mxu1 %v1647_v30  ;;  %v1355_v30 = vld [vmem:[%s2135_s2] ss:$0 sm:$0xff] }
  0x9f   : > { %1456 = vmatpush3.bf16.msra.mxu0 %v1646_v29  ;;  %v935_v62 = vld [vmem:[%s2137_s4] sm:$0x3] }
  0xa0   : > { %1485 = vmatprep.subr.bf16.mxu0 %v1649_v36 }
  0xa1   : > { %1478 = vmatpush3.bf16.msra.mxu1 %v1648_v33 }
  0xa2   : > { %790 = vmatmul.mubr.bf16.vlgmr.msra.gmra.mrb[0].mxu0 %v347_v35  ;;  %1531 = vmatprep.subr.bf16.mxu1 %v1872_v44 }
  0xa3   : > { %1486 = vmatpush3.bf16.msra.mxu0 %v1650_v39  ;;  %869 = vmatprep.mubr.bf16.mxu0 %v352_v56  ;;  %v1703_v56 = vld [vmem:[#allocation7 + $0x30] sm:$0xff]  }
  0xa4   : > { %830 = vmatmul.mubr.bf16.vlgmr.msra.gmra.mrb[0].mxu1 %v349_v41  ;;  %1487 = vmatprep.subr.bf16.mxu0 %v1651_v42 }
  0xa5   : > { %1533 = vmatprep.mubr.msk.bf16.mxu1 %vm1873_vm0, %v1872_v44  ;;  %1532 = vmatpush3.bf16.msra.mxu1 %v1665_v53 }
  0xa6   : > { %1027 = vmatprep.subr.bf16.mxu1 %v1668_v1 }
  0xa7   : > { %1488 = vmatpush3.bf16.msra.mxu0 %v1652_v43 }
  0xa8   : > { %1489 = vmatprep.subr.bf16.mxu0 %v1653_v45 }
  0xab   : > { %1490 = vmatpush3.bf16.msra.mxu0 %v1654_v46 }
  0xac   : > { %1491 = vmatprep.subr.bf16.mxu0 %v1655_v47  ;;  %1534 = vmatmul.mubr.msk.bf16.vlgmr.msra.gmra.mrb[4].mxu1 %vm753_vm1, %v353_v58  ;;  %v1705_v58 = vld [vmem:[#allocation7 + $0x38] sm:$0xff]  }
  0xad   : > { %1028 = vmatpush1.bf16.msra.mxu1 %v1666_v0  ;;  %1059 = vmatprep.mubr.bf16.mxu1 %v1874_v16 }
  0xae   : > { %1029 = vmatprep.subr.bf16.mxu1 %v1671_v2 }
  0xaf   : > { %1492 = vmatpush3.bf16.msra.mxu0 %v1656_v48 }
  0xb0   : > { %1493 = vmatprep.subr.bf16.mxu0 %v1657_v49 }
  0xb1   : > { %1030 = vmatpush1.bf16.msra.mxu1 %v1669_v3 }
  0xb2   : > { %1031 = vmatprep.subr.bf16.mxu1 %v1674_v4 }
  0xb3   : > { %1494 = vmatpush3.bf16.msra.mxu0 %v1658_v50 }
  0xb4   : > { %1495 = vmatprep.subr.bf16.mxu0 %v1659_v51 }
  0xb5   : > { %1032 = vmatpush1.bf16.msra.mxu1 %v1672_v5 }
  0xb6   : > { %1033 = vmatprep.subr.bf16.mxu1 %v1677_v6 }
  0xb7   : > { %1496 = vmatpush3.bf16.msra.mxu0 %v1660_v52 }
  0xb8   : > { %1497 = vmatprep.subr.bf16.mxu0 %v1661_v55  ;;  %v1702_v55 = vld [vmem:[#allocation7 + $0x70] sm:$0xff]  }
  0xb9   : > { %1034 = vmatpush1.bf16.msra.mxu1 %v1675_v7 }
  0xba   : > { %1035 = vmatprep.subr.bf16.mxu1 %v1680_v8 }
  0xbb   : > { %1498 = vmatpush3.bf16.msra.mxu0 %v1662_v59  ;;  %v937_v59 = vlaneseq }
  0xbc   : > { %1499 = vmatprep.subr.bf16.mxu0 %v1663_v60 }
  0xbd   : > { %1036 = vmatpush1.bf16.msra.mxu1 %v1678_v9  ;;  %v938_v60 = vshrl.u32 %v937_v59, 7 }
  0xbe   : > { %1037 = vmatprep.subr.bf16.mxu1 %v1683_v10 }
  0xbf   : > { %1500 = vmatpush3.bf16.msra.mxu0 %v1664_v61  ;;  %v939_v61 = vsub.s32 0, %v938_v60 }
  0xc0   : > { %1509 = vmatprep.subr.bf16.mxu0 %v1690_v17 }
  0xc1   : > { %1038 = vmatpush1.bf16.msra.mxu1 %v1681_v11  ;;  %v940_v0 = vrot.slane %v935_v62, %v939_v61 }
  0xc2   : > { %870 = vmatmul.mubr.bf16.vlgmr.msra.gmra.mrb[4].mxu0 %v351_v63  ;;  %1039 = vmatprep.subr.bf16.mxu1 %v1686_v12  ;;  %v943_v63 = vsub.s32 1, %v938_v60 }
  0xc3   : > { %1510 = vmatpush3.bf16.msra.mxu0 %v1691_v18 }
  0xc4   : > { %1511 = vmatprep.subr.bf16.mxu0 %v1692_v19  ;;  %v944_v1 = vrot.slane %v935_v62, %v943_v63 }
  0xc5   : > { %1040 = vmatpush1.bf16.msra.mxu1 %v1684_v13  ;;  %v1422_v13 = vld [vmem:[%s2139_s6] ss:$0 sm:$0xff] }
  0xc6   : > { %1041 = vmatprep.subr.bf16.mxu1 %v1689_v14 }
  0xc7   : > { %1512 = vmatpush3.bf16.msra.mxu0 %v1693_v20 }
  0xc8   : > { %1513 = vmatprep.subr.bf16.mxu0 %v1694_v21 }
  0xc9   : > { %1042 = vmatpush1.bf16.msra.mxu1 %v1687_v15 }
  0xcb   : > { %1514 = vmatpush3.bf16.msra.mxu0 %v1695_v22 }
  0xcc   : > { %1515 = vmatprep.subr.bf16.mxu0 %v1696_v23 }
  0xcf   : > { %1516 = vmatpush3.bf16.msra.mxu0 %v1697_v24 }
  0xd0   : > { %1517 = vmatprep.subr.bf16.mxu0 %v1698_v25 }
  0xd3   : > { %1518 = vmatpush3.bf16.msra.mxu0 %v1699_v26 }
  0xd4   : > { %1519 = vmatprep.subr.bf16.mxu0 %v1700_v27 }
  0xd7   : > { %1520 = vmatpush3.bf16.msra.mxu0 %v1701_v28 }
  0xd8   : > { %1521 = vmatprep.subr.bf16.mxu0 %v1702_v55 }
  0xdb   : > { %1522 = vmatpush3.bf16.msra.mxu0 %v1703_v56 }
  0xdc   : > { %1523 = vmatprep.subr.bf16.mxu0 %v1704_v57 }
  0xdf   : > { %1524 = vmatpush3.bf16.msra.mxu0 %v1705_v58 }
 0x175   : > { %v1457_v29 = vpop.f32.mrb[0].mxu0 }
 0x176   : > { %v1458_v31 = vpop.f32.mrb[1].mxu0 }
 0x177   : > { %v1459_v32 = vadd.f32 %v1458_v31, %v1457_v29  ;;  %v1460_v33 = vpop.f32.mrb[2].mxu0  ;;  %v1479_v34 = vpop.f32.mrb[0].mxu1 }
 0x178   : > { %v1461_v35 = vpop.f32.mrb[3].mxu0  ;;  %v1480_v37 = vpop.f32.mrb[1].mxu1 }
 0x179   : > { %v792_v36 = vadd.f32 %v1459_v32, %v1355_v30  ;;  %v1481_v38 = vadd.f32 %v1480_v37, %v1479_v34  ;;  %v1482_v39 = vpop.f32.mrb[2].mxu1 }
 0x17a   : > { %v1483_v40 = vpop.f32.mrb[3].mxu1 }
 0x17b   : > { %v832_v41 = vadd.f32 %v1481_v38, %v792_v36 }
 0x17f   : > { %v911_v42 = vpop.f32.mrb[4].mxu1 }
 0x180   : > { %v1535_v43 = vpop.f32.mrb[5].mxu1 }
 0x181   : > { %v914_v44 = vpop.f32.mrb[6].mxu1 }
 0x182   : > { %v1536_v45 = vpop.f32.mrb[7].mxu1 }
 0x195   : > { %v1501_v46 = vpop.f32.mrb[4].mxu0 }
 0x196   : > { %v1502_v47 = vpop.f32.mrb[5].mxu0 }
 0x197   : > { %v1503_v48 = vadd.f32 %v1502_v47, %v1501_v46  ;;  %v1504_v49 = vpop.f32.mrb[6].mxu0 }
 0x198   : > { %v1505_v50 = vpop.f32.mrb[7].mxu0 }
 0x199   : > { %v872_v51 = vadd.f32 %v1503_v48, %v832_v41 }
 0x19b   : > { %v912_v52 = vadd.f32 %v911_v42, %v872_v51 }
 0x19d   : > { %v917_v53 = vmax.f32 %v912_v52, 0.0 }
 0x19f   : > { %v918_v54 = vpack.c.bf16 %v917_v53, %v917_v53 }
 0x1a1   : > { %1060 = vmatmul.mubr.bf16.vlgmr.msra.gmra.mrb[8].mxu1 %v918_v54 }
 0x274   : > { %v1061_v2 = vpop.f32.mrb[8].mxu1 }
 0x275   : > { %v1062_v3 = vadd.f32 %v1061_v2, %v940_v0  ;;  %v1063_v4 = vpop.f32.mrb[9].mxu1 }
 0x276   : > { %v1064_v5 = vadd.f32 %v1063_v4, %v944_v1  ;;  %v1065_v6 = vpop.f32.mrb[10].mxu1 }
 0x277   : > { %v1068_v7 = vmax.f32 %v1062_v3, 0.0  ;;  %v1066_v8 = vpop.f32.mrb[11].mxu1 }
 0x278   : > { %v1069_v9 = vmax.f32 %v1064_v5, 0.0 }
 0x279   : > { %v1070_v11 = vpack.c.bf16 %v1068_v7, %v1068_v7 }
 0x27a   : > { %v1071_v10 = vpack.c.bf16 %v1069_v9, %v1069_v9 }
 0x27c   : > { %1239 = vmatprep.mubr.bf16.mxu0 %v1071_v10 }
 0x27d   : > { %1240 = vmatmul.mubr.bf16.vlgmr.msra.gmra.mrb[8].mxu0 %v1070_v11 }
 0x350   : > { %v1525_v12 = vpop.f32.mrb[8].mxu0 }
 0x351   : > { %v1526_v14 = vpop.f32.mrb[9].mxu0 }
 0x352   : > { %v1527_v15 = vadd.f32 %v1526_v14, %v1525_v12  ;;  %v1528_v16 = vpop.f32.mrb[10].mxu0 }
 0x353   : > { %v1529_v17 = vpop.f32.mrb[11].mxu0 }
 0x354   : > { %v1242_v18 = vadd.f32 %v1527_v15, %v1422_v13 }
 0x356   : > { %v1247_v19 = vpack.c.bf16 %v1242_v18, %v1242_v18 }
 0x358   : > { %1248 = vst [vmem:[%s338_s24] sm:$0xf] %v1247_v19 }
 0x359 PF: > { %p19_p4 = scmp.ge.s32.totalorder %s2011_s14, 4   ;;  %s2159_s24 = smov %s1854_s25 }
 0x35a   : > { %s2160_s25 = smov %s1858_s26  ;;  %s2161_s26 = smov %s2042_s10 }
 0x35b   : > { %s2162_s27 = smov %s2011_s14  ;;  %21 = sbr.rel (!%p19_p4) target bundleno = 5 (0x5), region = 100 }
 0x362   :  { %1268 = vsyncpa [#allocation3], 1 }
 0x363   :  { %1270 = vsyncpa [#allocation3 + $0x1], 1 }
 0x364   :  { %1271 = vsyncpa [#allocation5], 1 }
 0x365   :  { %1272 = vsyncpa [#allocation8], 1 }

</bundles_post_ra>
